<compile_context>
chip_gen: v7x
topology: tpu7x:2x2x1
jax: 0.10.0
libtpu: 0.0.40
codegen_flags: <defaults>
</compile_context>

<pallas_src>
import jax
import jax.numpy as jnp
from jax.experimental import pallas as pl
from jax.experimental.pallas import tpu as pltpu


_LANE = 128
_SUBLANE = 8
# ~4 MiB tiles: in + out, each double-buffered ≈ 16 MiB — fits the 32 MiB
# scoped VMEM default on every generation, including v7x (64 MiB physical).
_TARGET_TILE_BYTES = 4 << 20


def _identity_kernel(x_ref, o_ref):
    # Abstract Decoder "forward": emit X unchanged.
    o_ref[...] = x_ref[...]


def _choose_block_rows(rows, row_bytes):
    """Largest multiple-of-8 divisor of `rows` whose tile fits the VMEM target."""
    cap = max(_SUBLANE, _TARGET_TILE_BYTES // max(row_bytes, 1))
    cap = min(rows, cap)
    d = (cap // _SUBLANE) * _SUBLANE
    while d >= _SUBLANE:
        if rows % d == 0:
            return d
        d -= _SUBLANE
    # No sub-tiling possible under the (8,128) rule; use the full extent
    # (block dims equal to the full array dims are always legal).
    return rows


def decoder_forward(X, state):
    """Pallas implementation of the (abstract) Decoder forward.

    Returns (output, new_state) mirroring the d2l decoder convention
    `return output, state`.  output == X, state is unchanged (plain JAX glue).
    """
    B, S, H = X.shape
    total = B * S * H
    dtype = X.dtype
    itemsize = jnp.dtype(dtype).itemsize

    # Lane-dense flattening: make the last dim a multiple of 128 so the store
    # path uses full unmasked vst (measured ~4.5x better than masked stores).
    if total % _LANE == 0:
        lanes = _LANE
        rows = total // _LANE
    else:
        # TODO(synk): pad to a multiple of 128 lanes for full store density;
        # falling back to (B*S, H) full-extent blocks keeps correctness.
        lanes = H
        rows = B * S

    X2d = X.reshape(rows, lanes)

    block_rows = _choose_block_rows(rows, lanes * itemsize)
    n_tiles = rows // block_rows

    out2d = pl.pallas_call(
        _identity_kernel,
        out_shape=jax.ShapeDtypeStruct((rows, lanes), dtype),
        grid_spec=pltpu.PrefetchScalarGridSpec(
            num_scalar_prefetch=0,
            grid=(n_tiles,),
            in_specs=[pl.BlockSpec((block_rows, lanes), lambda i: (i, 0))],
            out_specs=pl.BlockSpec((block_rows, lanes), lambda i: (i, 0)),
        ),
        # Identity: alias the output onto the input buffer — no separate HBM
        # output allocation; with a donating caller no copy is materialized.
        input_output_aliases={0: 0},
        compiler_params=pltpu.CompilerParams(
            dimension_semantics=("parallel",),  # shards the grid across v7x's 2 TCs
        ),
    )(X2d)

    out = out2d.reshape(B, S, H)
    # State handling (init_state / state threading) is glue, not kernel work.
    return out, state


if __name__ == "__main__":
    key = jax.random.PRNGKey(0)
    kx, ks = jax.random.split(key)

    B, S, H = 2, 8, 32
    X = jax.random.normal(kx, (B, S, H), dtype=jnp.float32)
    state = jax.random.normal(ks, (B, H), dtype=jnp.float32)

    # Snapshot X before the call (the kernel output aliases its input buffer).
    expected = jnp.copy(X)

    out, new_state = decoder_forward(X, state)
    jax.block_until_ready(out)
    jax.block_until_ready(new_state)

    # Sanity: abstract decoder pass-through must preserve X and state exactly.
    assert out.shape == (B, S, H) and new_state.shape == state.shape
    assert bool(jnp.all(out == expected))
    assert bool(jnp.all(new_state == state))

    print("KERNEL_OK")
</pallas_src>

<mosaic_0001>
module attributes {stable_mosaic.version = 11 : i64} {
  func.func @_identity_kernel(%arg0: i32, %arg1: memref<4x128xf32, #tpu.memory_space<vmem>>, %arg2: memref<4x128xf32, #tpu.memory_space<vmem>>) attributes {dimension_semantics = [#tpu.dimension_semantics<parallel>], iteration_bounds = array<i64: 1>, scalar_prefetch = 0 : i64, scratch_operands = 0 : i64, tpu.core_type = #tpu.core_type<tc>, window_params = [{transform_indices = @transform_0, window_bounds = array<i64: 4, 128>}, {transform_indices = @transform_1, window_bounds = array<i64: 4, 128>}]} {
    %c0 = arith.constant 0 : index
    %c0_0 = arith.constant 0 : index
    %0 = vector.load %arg1[%c0, %c0_0] : memref<4x128xf32, #tpu.memory_space<vmem>>, vector<4x128xf32>
    %c0_1 = arith.constant 0 : index
    %c0_2 = arith.constant 0 : index
    %1 = vector.load %arg2[%c0_1, %c0_2] : memref<4x128xf32, #tpu.memory_space<vmem>>, vector<4x128xf32>
    tpu.vector_store %arg2[%c0_1, %c0_2], %0 {strides = array<i32>} : memref<4x128xf32, #tpu.memory_space<vmem>>, vector<4x128xf32>,
    return
  }
  func.func @transform_0(%arg0: i32) -> (i32, i32) {
    %c0_i32 = arith.constant 0 : i32
    %c0_i32_0 = arith.constant 0 : i32
    return %arg0, %c0_i32 : i32, i32
  }
  func.func @transform_1(%arg0: i32) -> (i32, i32) {
    %c0_i32 = arith.constant 0 : i32
    %c0_i32_0 = arith.constant 0 : i32
    return %arg0, %c0_i32 : i32, i32
  }
}

</mosaic_0001>

<bundles_post_ra>
// kernel: tpu_custom_call.1
= control target key start
LH: loop header
LB: loop body
LE: loop exit
PB: predicated region body
PF: predicated region fallthrough
CT: control target
= control target key end

     0   :  { %6 = vsyncpa [#allocation3], 0  ;;  %s124_s0 = inlined_call_operand.hbm [shape: f32[4,128], index: 0, kind: input, shape index: {}, may-alias: {0,1}]   ;;  %s125_s1 = inlined_call_operand.hbm [shape: f32[4,128], index: 1, kind: output, shape index: {}, may-alias: {0,1}]  }
   0x1   :  { %7 = vsyncpa [#allocation4], 0  ;;  %s88_s6 = smov [#allocation2]   ;;  %s40_s10 = scalar_lea.hbm %s124_s0, 64 }
   0x2   :  { %s14_s7 = sshll.u32 %s88_s6, 4  ;;  %p41_p0 = scmp.ne.s32.totalorder %s124_s0, %s40_s10  ;;  %s15_s7 = int_to_ptr.vmem [resolvable:$true] %s14_s7 }
   0x3   :  { %p44_p1 = scmp.lt.u32.totalorder %s40_s10, %s124_s0 }
   0x5   :  { %p46_p2 = pnand %p44_p1, %p41_p0 }
   0x7   :  { %49 = shalt.err (!%p46_p2)
}
   0x8   :  { %s50_s15 = scalar_lea.vmem %s15_s7, 64  ;;  %p55_p4 = scmp.lt.s32.totalorder %s15_s7, %s15_s7 }
   0x9   :  { %p51_p3 = scmp.ne.s32.totalorder %s15_s7, %s50_s15  ;;  %p56_p5 = scmp.lt.s32.totalorder %s50_s15, %s50_s15 }
   0xb   :  { %p57_p6 = por %p56_p5, %p55_p4 }
   0xd   :  { %p58_p7 = pnand %p57_p6, %p51_p3 }
   0xf   :  { %61 = shalt.err (!%p58_p7)
}
  0x10   :  { %17 = dma.hbm_to_vmem [thread:$0]  %s124_s0, 64, %s15_s7, [#allocation3]  }
  0x11   :  { %84 = dma.done.wait [#allocation3], 64  }
  0x12   :  { %85 = vsyncadd [#allocation3], 4294967232  ;;  %s89_s18 = smov [#allocation5]   ;;  %v21_v0 = vld [vmem:[#allocation2] sm:$0xf] }
  0x13   :  { %s29_s19 = sshll.u32 %s89_s18, 4  ;;  %22 = vst [vmem:[#allocation5] sm:$0xf] %v21_v0  ;;  %s30_s19 = int_to_ptr.vmem [resolvable:$true] %s29_s19 }
  0x14   :  { %s62_s20 = scalar_lea.vmem %s30_s19, 64  ;;  %p67_p9 = scmp.lt.s32.totalorder %s30_s19, %s30_s19 }
  0x15   :  { %p63_p8 = scmp.ne.s32.totalorder %s30_s19, %s62_s20  ;;  %p68_p10 = scmp.lt.s32.totalorder %s62_s20, %s62_s20 }
  0x17   :  { %p69_p11 = por %p68_p10, %p67_p9 }
  0x19   :  { %p70_p12 = pnand %p69_p11, %p63_p8 }
  0x1b   :  { %73 = shalt.err (!%p70_p12)
}
  0x1c   :  { %s74_s23 = scalar_lea.hbm %s125_s1, 64 }
  0x1d   :  { %p75_p13 = scmp.ne.s32.totalorder %s125_s1, %s74_s23  ;;  %p78_p0 = scmp.lt.u32.totalorder %s74_s23, %s125_s1 }
  0x1f   :  { %p80_p1 = pnand %p78_p0, %p75_p13 }
  0x21   :  { %83 = shalt.err (!%p80_p1)
}
  0x22   :  { %32 = dma.vmem_to_hbm [thread:$0]  %s30_s19, 64, %s125_s1, [#allocation4]  }
  0x23   :  { %86 = dma.done.wait [#allocation4], 64  }
  0x24   :  { %87 = vsyncadd [#allocation4], 4294967232 }
  0x25   :  { %36 = vsyncpa [#allocation3], 1 }
  0x26   :  { %37 = vsyncpa [#allocation4], 1 }

</bundles_post_ra>
